<compile_context>
chip_gen: v5e
topology: v5e:2x2
jax: 0.10.0
libtpu: 0.0.40
codegen_flags: <defaults>
</compile_context>

<pallas_src>
import functools

import jax
import jax.numpy as jnp
from jax.experimental import pallas as pl
from jax.experimental.pallas import tpu as pltpu

BN_EPS = 1e-5


def _se_layer_kernel(x_ref, wt_ref, gamma_ref, beta_ref, wfc_ref, bfc_ref,
                     out_ref, sum_ref, sumsq_ref, pool_ref,
                     *, inv_count, inv_hw, eps):
    # x_ref:     (1, Cin, tile_s)  one spatial tile of one batch element (NCHW order)
    # wt_ref:    (Cout, Cin)       1x1 conv weight, transposed
    # gamma_ref: (Cout, 1)         BN weight
    # beta_ref:  (Cout, 1)         BN bias
    # wfc_ref:   (Cout, n_classes) Linear weight (pre-transposed)
    # bfc_ref:   (1, n_classes)    Linear bias
    # out_ref:   (N, n_classes)    full output, written once on the last step
    # scratch:   sum_ref/sumsq_ref (Cout, 1), pool_ref (Cout, N)
    p = pl.program_id(0)            # 0 = stats pass, 1 = normalize/pool/finalize
    b = pl.program_id(1)            # batch index
    s = pl.program_id(2)            # spatial tile index
    n_b = pl.num_programs(1)
    n_s = pl.num_programs(2)

    is_first = jnp.logical_and(b == 0, s == 0)
    is_last = jnp.logical_and(b == n_b - 1, s == n_s - 1)

    # 1x1 conv on this tile (recomputed in pass 1; FLOPs are negligible and the
    # kernel is HBM-bound).  (Cout, Cin) @ (Cin, tile_s) -> (Cout, tile_s).
    x = x_ref[0]                                                # (Cin, tile_s)
    y = jnp.dot(wt_ref[...], x, preferred_element_type=jnp.float32)

    @pl.when(jnp.logical_and(p == 0, is_first))
    def _init():
        sum_ref[...] = jnp.zeros_like(sum_ref)
        sumsq_ref[...] = jnp.zeros_like(sumsq_ref)
        pool_ref[...] = jnp.zeros_like(pool_ref)

    @pl.when(p == 0)
    def _stats():
        # Per-channel streaming moments (lane reductions).
        sum_ref[...] = sum_ref[...] + jnp.sum(y, axis=1, keepdims=True)
        sumsq_ref[...] = sumsq_ref[...] + jnp.sum(y * y, axis=1, keepdims=True)

    @pl.when(p == 1)
    def _apply():
        mean = sum_ref[...] * inv_count                          # (Cout, 1)
        var = sumsq_ref[...] * inv_count - mean * mean           # biased var
        gamma = gamma_ref[...].astype(jnp.float32)
        beta = beta_ref[...].astype(jnp.float32)
        scale = gamma * jax.lax.rsqrt(var + eps)                 # (Cout, 1)
        shift = beta - mean * scale
        t = jnp.maximum(y * scale + shift, 0.0)                  # (Cout, tile_s)
        contrib = jnp.sum(t, axis=1, keepdims=True)              # (Cout, 1)
        # Masked add into column b of the (Cout, N) pooled accumulator —
        # avoids any dynamic-index stores.
        lane = jax.lax.broadcasted_iota(jnp.int32, pool_ref.shape, 1)
        pool_ref[...] = pool_ref[...] + jnp.where(lane == b, contrib, 0.0)

    @pl.when(jnp.logical_and(p == 1, is_last))
    def _finalize():
        pooled = pool_ref[...].T * inv_hw                        # (N, Cout)
        out = jnp.dot(pooled, wfc_ref[...].astype(jnp.float32),
                      preferred_element_type=jnp.float32)
        out = out + bfc_ref[...].astype(jnp.float32)
        out_ref[...] = out.astype(out_ref.dtype)


def _pick_spatial_tile(s_total, cin, itemsize, vmem_budget_bytes=8 << 20):
    """Largest spatial tile whose double-buffered (Cin, tile) block fits the budget,
    preferring 128-multiple divisors of s_total (lane alignment)."""
    cap = max(128, vmem_budget_bytes // max(1, 2 * cin * itemsize))
    start = (min(s_total, cap) // 128) * 128
    for cand in range(start, 127, -128):
        if s_total % cand == 0:
            return cand
    if s_total <= cap:
        return s_total          # full spatial extent as a single block
    # TODO(synk): for very large, awkwardly-sized H*W, pad S to a 128 multiple
    # in the wrapper and mask the padded pixels in the pool pass.
    return s_total


def se_layer_forward(x_nchw, wconv, bn_gamma, bn_beta, wfc, bfc):
    """x_nchw: (N, Cin, H, W). wconv: (Cin, Cout). Returns (N, n_classes) f32."""
    n, cin, h, w = x_nchw.shape
    cout = wconv.shape[1]
    n_classes = wfc.shape[1]
    s_total = h * w

    tile_s = _pick_spatial_tile(s_total, cin, x_nchw.dtype.itemsize)
    assert s_total % tile_s == 0
    n_s_tiles = s_total // tile_s

    # Free reshape only — NCHW ordering kept, no HBM transpose.
    x = x_nchw.reshape(n, cin, s_total)
    wt = wconv.T.astype(x_nchw.dtype)            # (Cout, Cin); MXU widens bf16

    kernel = functools.partial(
        _se_layer_kernel,
        inv_count=1.0 / float(n * s_total),      # BN stats over (N, H, W)
        inv_hw=1.0 / float(s_total),             # adaptive avg pool divisor
        eps=BN_EPS,
    )

    grid = (2, n, n_s_tiles)                     # (pass, batch, spatial tile)
    return pl.pallas_call(
        kernel,
        out_shape=jax.ShapeDtypeStruct((n, n_classes), jnp.float32),
        grid_spec=pltpu.PrefetchScalarGridSpec(
            num_scalar_prefetch=0,
            grid=grid,
            in_specs=[
                pl.BlockSpec((1, cin, tile_s), lambda p, b, s: (b, 0, s)),
                pl.BlockSpec((cout, cin), lambda p, b, s: (0, 0)),
                pl.BlockSpec((cout, 1), lambda p, b, s: (0, 0)),
                pl.BlockSpec((cout, 1), lambda p, b, s: (0, 0)),
                pl.BlockSpec((cout, n_classes), lambda p, b, s: (0, 0)),
                pl.BlockSpec((1, n_classes), lambda p, b, s: (0, 0)),
            ],
            out_specs=pl.BlockSpec((n, n_classes), lambda p, b, s: (0, 0)),
            scratch_shapes=[
                pltpu.VMEM((cout, 1), jnp.float32),   # per-channel sum
                pltpu.VMEM((cout, 1), jnp.float32),   # per-channel sum of squares
                pltpu.VMEM((cout, n), jnp.float32),   # per-batch pooled sums
            ],
        ),
        compiler_params=pltpu.CompilerParams(
            # BN statistics are global over all grid steps, so every axis must
            # stay sequential (megacore split would need cross-core combine).
            dimension_semantics=("arbitrary", "arbitrary", "arbitrary")),
    )(x, wt,
      bn_gamma.reshape(cout, 1),
      bn_beta.reshape(cout, 1),
      wfc,
      bfc.reshape(1, n_classes))


def _reference(x_nchw, wconv, bn_gamma, bn_beta, wfc, bfc):
    """Pure-JAX reference matching the PyTorch forward (train-mode BN)."""
    y = jnp.einsum('nchw,cd->ndhw', x_nchw, wconv)
    mean = jnp.mean(y, axis=(0, 2, 3), keepdims=True)
    var = jnp.mean((y - mean) ** 2, axis=(0, 2, 3), keepdims=True)
    y = (y - mean) / jnp.sqrt(var + BN_EPS)
    y = y * bn_gamma[None, :, None, None] + bn_beta[None, :, None, None]
    t = jnp.maximum(y, 0.0)
    pooled = jnp.mean(t, axis=(2, 3))            # (N, Cout)  == avgpool+squeeze
    return pooled @ wfc + bfc


if __name__ == "__main__":
    # Small shapes consistent with the module.
    N, Cin, H, W = 2, 4, 16, 16
    Cout, n_classes = 8, 6

    key = jax.random.PRNGKey(0)
    k1, k2, k3, k4 = jax.random.split(key, 4)

    x = jax.random.normal(k1, (N, Cin, H, W), dtype=jnp.float32)

    # Deterministic synthetic parameters (shapes from __init__).
    wconv = jax.random.normal(k2, (Cin, Cout), dtype=jnp.float32) * 0.5  # Conv2d(Cin,Cout,1,bias=False)
    bn_gamma = jnp.ones((Cout,), dtype=jnp.float32)                      # BatchNorm2d weight
    bn_beta = jnp.zeros((Cout,), dtype=jnp.float32)                      # BatchNorm2d bias
    wfc = jax.random.normal(k3, (Cout, n_classes), dtype=jnp.float32) * 0.3  # Linear weight^T
    bfc = jax.random.normal(k4, (n_classes,), dtype=jnp.float32) * 0.1       # Linear bias

    out = se_layer_forward(x, wconv, bn_gamma, bn_beta, wfc, bfc)
    out = jax.block_until_ready(out)

    ref = _reference(x, wconv, bn_gamma, bn_beta, wfc, bfc)
    assert out.shape == (N, n_classes)
    assert jnp.allclose(out, ref, atol=2e-4, rtol=2e-4)

    print("KERNEL_OK")
</pallas_src>

<mosaic_0001>
module attributes {stable_mosaic.version = 11 : i64} {
  func.func @_se_layer_kernel(%arg0: i32, %arg1: i32, %arg2: i32, %arg3: memref<1x4x256xf32, #tpu.memory_space<vmem>>, %arg4: memref<8x4xf32, #tpu.memory_space<vmem>>, %arg5: memref<8x1xf32, #tpu.memory_space<vmem>>, %arg6: memref<8x1xf32, #tpu.memory_space<vmem>>, %arg7: memref<8x6xf32, #tpu.memory_space<vmem>>, %arg8: memref<1x6xf32, #tpu.memory_space<vmem>>, %arg9: memref<2x6xf32, #tpu.memory_space<vmem>>, %arg10: memref<8x1xf32, #tpu.memory_space<vmem>>, %arg11: memref<8x1xf32, #tpu.memory_space<vmem>>, %arg12: memref<8x2xf32, #tpu.memory_space<vmem>>) attributes {dimension_semantics = [#tpu.dimension_semantics<arbitrary>, #tpu.dimension_semantics<arbitrary>, #tpu.dimension_semantics<arbitrary>], iteration_bounds = array<i64: 2, 2, 1>, scalar_prefetch = 0 : i64, scratch_operands = 3 : i64, tpu.core_type = #tpu.core_type<tc>, window_params = [{transform_indices = @transform_0, window_bounds = array<i64: 1, 4, 256>}, {pipeline_mode = #tpu.pipeline_mode<synchronous>, transform_indices = @transform_1, window_bounds = array<i64: 8, 4>}, {pipeline_mode = #tpu.pipeline_mode<synchronous>, transform_indices = @transform_2, window_bounds = array<i64: 8, 1>}, {pipeline_mode = #tpu.pipeline_mode<synchronous>, transform_indices = @transform_3, window_bounds = array<i64: 8, 1>}, {pipeline_mode = #tpu.pipeline_mode<synchronous>, transform_indices = @transform_4, window_bounds = array<i64: 8, 6>}, {pipeline_mode = #tpu.pipeline_mode<synchronous>, transform_indices = @transform_5, window_bounds = array<i64: 1, 6>}, {pipeline_mode = #tpu.pipeline_mode<synchronous>, transform_indices = @transform_6, window_bounds = array<i64: 2, 6>}]} {
    %c0_i32 = arith.constant 0 : i32
    %0 = arith.cmpi eq, %arg1, %c0_i32 : i32
    %c0_i32_0 = arith.constant 0 : i32
    %1 = arith.cmpi eq, %arg2, %c0_i32_0 : i32
    %2 = arith.andi %0, %1 : i1
    %c1_i32 = arith.constant 1 : i32
    %3 = arith.cmpi eq, %arg1, %c1_i32 : i32
    %c0_i32_1 = arith.constant 0 : i32
    %4 = arith.cmpi eq, %arg2, %c0_i32_1 : i32
    %5 = arith.andi %3, %4 : i1
    %c0 = arith.constant 0 : index
    %c0_2 = arith.constant 0 : index
    %c0_3 = arith.constant 0 : index
    %6 = vector.load %arg3[%c0, %c0_2, %c0_3] : memref<1x4x256xf32, #tpu.memory_space<vmem>>, vector<1x4x256xf32>
    %7 = vector.shape_cast %6 : vector<1x4x256xf32> to vector<4x256xf32>
    %c0_4 = arith.constant 0 : index
    %c0_5 = arith.constant 0 : index
    %8 = vector.load %arg4[%c0_4, %c0_5] : memref<8x4xf32, #tpu.memory_space<vmem>>, vector<8x4xf32>
    %cst = arith.constant dense<0.000000e+00> : vector<8x256xf32>
    %9 = tpu.matmul %8, %7, %cst {dimension_numbers = #tpu.dot_dimension_numbers<[1], [0], [0], [1], [0, 0, 1, 1], [], []>} : vector<8x4xf32>, vector<4x256xf32>, vector<8x256xf32> -> vector<8x256xf32>
    %c0_i32_6 = arith.constant 0 : i32
    %10 = arith.cmpi eq, %arg0, %c0_i32_6 : i32
    %11 = arith.andi %10, %2 : i1
    %12 = arith.extui %11 : i1 to i32
    %c0_i32_7 = arith.constant 0 : i32
    %13 = arith.cmpi ne, %12, %c0_i32_7 : i32
    scf.if %13 {
      %cst_14 = arith.constant 0.000000e+00 : f32
      %24 = vector.broadcast %cst_14 : f32 to vector<8x1xf32>
      %c0_15 = arith.constant 0 : index
      %c0_16 = arith.constant 0 : index
      %25 = vector.load %arg10[%c0_15, %c0_16] : memref<8x1xf32, #tpu.memory_space<vmem>>, vector<8x1xf32>
      tpu.vector_store %arg10[%c0_15, %c0_16], %24 {strides = array<i32>} : memref<8x1xf32, #tpu.memory_space<vmem>>, vector<8x1xf32>,
      %cst_17 = arith.constant 0.000000e+00 : f32
      %26 = vector.broadcast %cst_17 : f32 to vector<8x1xf32>
      %c0_18 = arith.constant 0 : index
      %c0_19 = arith.constant 0 : index
      %27 = vector.load %arg11[%c0_18, %c0_19] : memref<8x1xf32, #tpu.memory_space<vmem>>, vector<8x1xf32>
      tpu.vector_store %arg11[%c0_18, %c0_19], %26 {strides = array<i32>} : memref<8x1xf32, #tpu.memory_space<vmem>>, vector<8x1xf32>,
      %cst_20 = arith.constant 0.000000e+00 : f32
      %28 = vector.broadcast %cst_20 : f32 to vector<8x2xf32>
      %c0_21 = arith.constant 0 : index
      %c0_22 = arith.constant 0 : index
      %29 = vector.load %arg12[%c0_21, %c0_22] : memref<8x2xf32, #tpu.memory_space<vmem>>, vector<8x2xf32>
      tpu.vector_store %arg12[%c0_21, %c0_22], %28 {strides = array<i32>} : memref<8x2xf32, #tpu.memory_space<vmem>>, vector<8x2xf32>,
    } else {
    }
    %c0_i32_8 = arith.constant 0 : i32
    %14 = arith.cmpi eq, %arg0, %c0_i32_8 : i32
    %15 = arith.extui %14 : i1 to i32
    %c0_i32_9 = arith.constant 0 : i32
    %16 = arith.cmpi ne, %15, %c0_i32_9 : i32
    scf.if %16 {
      %c0_14 = arith.constant 0 : index
      %c0_15 = arith.constant 0 : index
      %24 = vector.load %arg10[%c0_14, %c0_15] : memref<8x1xf32, #tpu.memory_space<vmem>>, vector<8x1xf32>
      %cst_16 = arith.constant dense<0.000000e+00> : vector<8xf32>
      %25 = vector.multi_reduction <add>, %9, %cst_16 [1] : vector<8x256xf32> to vector<8xf32>
      %26 = vector.shape_cast %25 : vector<8xf32> to vector<8x1xf32>
      %27 = arith.addf %24, %26 : vector<8x1xf32>
      %c0_17 = arith.constant 0 : index
      %c0_18 = arith.constant 0 : index
      %28 = vector.load %arg10[%c0_17, %c0_18] : memref<8x1xf32, #tpu.memory_space<vmem>>, vector<8x1xf32>
      tpu.vector_store %arg10[%c0_17, %c0_18], %27 {strides = array<i32>} : memref<8x1xf32, #tpu.memory_space<vmem>>, vector<8x1xf32>,
      %c0_19 = arith.constant 0 : index
      %c0_20 = arith.constant 0 : index
      %29 = vector.load %arg11[%c0_19, %c0_20] : memref<8x1xf32, #tpu.memory_space<vmem>>, vector<8x1xf32>
      %30 = arith.mulf %9, %9 : vector<8x256xf32>
      %cst_21 = arith.constant dense<0.000000e+00> : vector<8xf32>
      %31 = vector.multi_reduction <add>, %30, %cst_21 [1] : vector<8x256xf32> to vector<8xf32>
      %32 = vector.shape_cast %31 : vector<8xf32> to vector<8x1xf32>
      %33 = arith.addf %29, %32 : vector<8x1xf32>
      %c0_22 = arith.constant 0 : index
      %c0_23 = arith.constant 0 : index
      %34 = vector.load %arg11[%c0_22, %c0_23] : memref<8x1xf32, #tpu.memory_space<vmem>>, vector<8x1xf32>
      tpu.vector_store %arg11[%c0_22, %c0_23], %33 {strides = array<i32>} : memref<8x1xf32, #tpu.memory_space<vmem>>, vector<8x1xf32>,
    } else {
    }
    %c1_i32_10 = arith.constant 1 : i32
    %17 = arith.cmpi eq, %arg0, %c1_i32_10 : i32
    %18 = arith.extui %17 : i1 to i32
    %c0_i32_11 = arith.constant 0 : i32
    %19 = arith.cmpi ne, %18, %c0_i32_11 : i32
    scf.if %19 {
      %c0_14 = arith.constant 0 : index
      %c0_15 = arith.constant 0 : index
      %24 = vector.load %arg10[%c0_14, %c0_15] : memref<8x1xf32, #tpu.memory_space<vmem>>, vector<8x1xf32>
      %cst_16 = arith.constant 0.001953125 : f32
      %25 = vector.broadcast %cst_16 : f32 to vector<8x1xf32>
      %26 = arith.mulf %24, %25 : vector<8x1xf32>
      %c0_17 = arith.constant 0 : index
      %c0_18 = arith.constant 0 : index
      %27 = vector.load %arg11[%c0_17, %c0_18] : memref<8x1xf32, #tpu.memory_space<vmem>>, vector<8x1xf32>
      %cst_19 = arith.constant 0.001953125 : f32
      %28 = vector.broadcast %cst_19 : f32 to vector<8x1xf32>
      %29 = arith.mulf %27, %28 : vector<8x1xf32>
      %30 = arith.mulf %26, %26 : vector<8x1xf32>
      %31 = arith.subf %29, %30 : vector<8x1xf32>
      %c0_20 = arith.constant 0 : index
      %c0_21 = arith.constant 0 : index
      %32 = vector.load %arg5[%c0_20, %c0_21] : memref<8x1xf32, #tpu.memory_space<vmem>>, vector<8x1xf32>
      %c0_22 = arith.constant 0 : index
      %c0_23 = arith.constant 0 : index
      %33 = vector.load %arg6[%c0_22, %c0_23] : memref<8x1xf32, #tpu.memory_space<vmem>>, vector<8x1xf32>
      %cst_24 = arith.constant 9.99999974E-6 : f32
      %34 = vector.broadcast %cst_24 : f32 to vector<8x1xf32>
      %35 = arith.addf %31, %34 : vector<8x1xf32>
      %36 = math.rsqrt %35 : vector<8x1xf32>
      %37 = arith.mulf %32, %36 : vector<8x1xf32>
      %38 = arith.mulf %26, %37 : vector<8x1xf32>
      %39 = arith.subf %33, %38 : vector<8x1xf32>
      %40 = vector.broadcast %37 : vector<8x1xf32> to vector<8x256xf32>
      %41 = arith.mulf %9, %40 : vector<8x256xf32>
      %42 = vector.broadcast %39 : vector<8x1xf32> to vector<8x256xf32>
      %43 = arith.addf %41, %42 : vector<8x256xf32>
      %cst_25 = arith.constant 0.000000e+00 : f32
      %44 = vector.broadcast %cst_25 : f32 to vector<8x256xf32>
      %45 = arith.maximumf %43, %44 : vector<8x256xf32>
      %cst_26 = arith.constant dense<0.000000e+00> : vector<8xf32>
      %46 = vector.multi_reduction <add>, %45, %cst_26 [1] : vector<8x256xf32> to vector<8xf32>
      %47 = vector.shape_cast %46 : vector<8xf32> to vector<8x1xf32>
      %48 = tpu.iota {dimensions = array<i32: 1>} : vector<8x2xi32>
      %c0_27 = arith.constant 0 : index
      %c0_28 = arith.constant 0 : index
      %49 = vector.load %arg12[%c0_27, %c0_28] : memref<8x2xf32, #tpu.memory_space<vmem>>, vector<8x2xf32>
      %50 = vector.broadcast %arg1 : i32 to vector<8x2xi32>
      %51 = arith.cmpi eq, %48, %50 : vector<8x2xi32>
      %cst_29 = arith.constant 0.000000e+00 : f32
      %52 = vector.shape_cast %47 : vector<8x1xf32> to vector<8x1xf32>
      %53 = vector.broadcast %52 : vector<8x1xf32> to vector<8x2xf32>
      %54 = vector.broadcast %cst_29 : f32 to vector<8x2xf32>
      %55 = arith.select %51, %53, %54 : vector<8x2xi1>, vector<8x2xf32>
      %56 = arith.addf %49, %55 : vector<8x2xf32>
      %c0_30 = arith.constant 0 : index
      %c0_31 = arith.constant 0 : index
      %57 = vector.load %arg12[%c0_30, %c0_31] : memref<8x2xf32, #tpu.memory_space<vmem>>, vector<8x2xf32>
      tpu.vector_store %arg12[%c0_30, %c0_31], %56 {strides = array<i32>} : memref<8x2xf32, #tpu.memory_space<vmem>>, vector<8x2xf32>,
    } else {
    }
    %c1_i32_12 = arith.constant 1 : i32
    %20 = arith.cmpi eq, %arg0, %c1_i32_12 : i32
    %21 = arith.andi %20, %5 : i1
    %22 = arith.extui %21 : i1 to i32
    %c0_i32_13 = arith.constant 0 : i32
    %23 = arith.cmpi ne, %22, %c0_i32_13 : i32
    scf.if %23 {
      %c0_14 = arith.constant 0 : index
      %c0_15 = arith.constant 0 : index
      %24 = vector.load %arg12[%c0_14, %c0_15] : memref<8x2xf32, #tpu.memory_space<vmem>>, vector<8x2xf32>
      %25 = tpu.transpose %24, [1, 0] : vector<8x2xf32> -> vector<2x8xf32>
      %cst_16 = arith.constant 3.906250e-03 : f32
      %26 = vector.broadcast %cst_16 : f32 to vector<2x8xf32>
      %27 = arith.mulf %25, %26 : vector<2x8xf32>
      %c0_17 = arith.constant 0 : index
      %c0_18 = arith.constant 0 : index
      %28 = vector.load %arg7[%c0_17, %c0_18] : memref<8x6xf32, #tpu.memory_space<vmem>>, vector<8x6xf32>
      %cst_19 = arith.constant dense<0.000000e+00> : vector<2x6xf32>
      %29 = tpu.matmul %27, %28, %cst_19 {dimension_numbers = #tpu.dot_dimension_numbers<[1], [0], [0], [1], [0, 0, 1, 1], [], []>} : vector<2x8xf32>, vector<8x6xf32>, vector<2x6xf32> -> vector<2x6xf32>
      %c0_20 = arith.constant 0 : index
      %c0_21 = arith.constant 0 : index
      %30 = vector.load %arg8[%c0_20, %c0_21] : memref<1x6xf32, #tpu.memory_space<vmem>>, vector<1x6xf32>
      %31 = vector.broadcast %30 : vector<1x6xf32> to vector<2x6xf32>
      %32 = arith.addf %29, %31 : vector<2x6xf32>
      %c0_22 = arith.constant 0 : index
      %c0_23 = arith.constant 0 : index
      %33 = vector.load %arg9[%c0_22, %c0_23] : memref<2x6xf32, #tpu.memory_space<vmem>>, vector<2x6xf32>
      tpu.vector_store %arg9[%c0_22, %c0_23], %32 {strides = array<i32>} : memref<2x6xf32, #tpu.memory_space<vmem>>, vector<2x6xf32>,
    } else {
    }
    return
  }
  func.func @transform_0(%arg0: i32, %arg1: i32, %arg2: i32) -> (i32, i32, i32) {
    %c0_i32 = arith.constant 0 : i32
    %c0_i32_0 = arith.constant 0 : i32
    return %arg1, %c0_i32, %arg2 : i32, i32, i32
  }
  func.func @transform_1(%arg0: i32, %arg1: i32, %arg2: i32) -> (i32, i32) {
    %c0_i32 = arith.constant 0 : i32
    %c0_i32_0 = arith.constant 0 : i32
    %c0_i32_1 = arith.constant 0 : i32
    return %c0_i32, %c0_i32_0 : i32, i32
  }
  func.func @transform_2(%arg0: i32, %arg1: i32, %arg2: i32) -> (i32, i32) {
    %c0_i32 = arith.constant 0 : i32
    %c0_i32_0 = arith.constant 0 : i32
    %c0_i32_1 = arith.constant 0 : i32
    return %c0_i32, %c0_i32_0 : i32, i32
  }
  func.func @transform_3(%arg0: i32, %arg1: i32, %arg2: i32) -> (i32, i32) {
    %c0_i32 = arith.constant 0 : i32
    %c0_i32_0 = arith.constant 0 : i32
    %c0_i32_1 = arith.constant 0 : i32
    return %c0_i32, %c0_i32_0 : i32, i32
  }
  func.func @transform_4(%arg0: i32, %arg1: i32, %arg2: i32) -> (i32, i32) {
    %c0_i32 = arith.constant 0 : i32
    %c0_i32_0 = arith.constant 0 : i32
    %c0_i32_1 = arith.constant 0 : i32
    return %c0_i32, %c0_i32_0 : i32, i32
  }
  func.func @transform_5(%arg0: i32, %arg1: i32, %arg2: i32) -> (i32, i32) {
    %c0_i32 = arith.constant 0 : i32
    %c0_i32_0 = arith.constant 0 : i32
    %c0_i32_1 = arith.constant 0 : i32
    return %c0_i32, %c0_i32_0 : i32, i32
  }
  func.func @transform_6(%arg0: i32, %arg1: i32, %arg2: i32) -> (i32, i32) {
    %c0_i32 = arith.constant 0 : i32
    %c0_i32_0 = arith.constant 0 : i32
    %c0_i32_1 = arith.constant 0 : i32
    return %c0_i32, %c0_i32_0 : i32, i32
  }
}

</mosaic_0001>

<bundles_post_ra>
// kernel: tpu_custom_call.1
= control target key start
LH: loop header
LB: loop body
LE: loop exit
PB: predicated region body
PF: predicated region fallthrough
CT: control target
= control target key end

     0   :  { %11 = vsyncpa [#allocation6], 0  ;;  %s741_s21 = smov 0   ;;  %s743_s22 = smov 0   ;;  %s827_s0 = inlined_call_operand.vmem [shape: f32[2,4,256], index: 0, kind: input, shape index: {}]   ;;  %s828_s1 = inlined_call_operand.vmem [shape: f32[8,4], index: 1, kind: input, shape index: {}]   ;;  %s829_s2 = inlined_call_operand.vmem [shape: f32[8,1], index: 2, kind: input, shape index: {}]   ;;  %s830_s3 = inlined_call_operand.vmem [shape: f32[8,1], index: 3, kind: input, shape index: {}]   ;;  %s831_s4 = inlined_call_operand.vmem [shape: f32[8,6], index: 4, kind: input, shape index: {}]   ;;  %s832_s5 = inlined_call_operand.vmem [shape: f32[1,6], index: 5, kind: input, shape index: {}]   ;;  %s833_s6 = inlined_call_operand.hbm [shape: f32[2,6], index: 6, kind: output, shape index: {}]  }
   0x1   :  { %s745_s23 = smov 0   ;;  %s747_s24 = smov 0  }
   0x2   :  { %s749_s25 = smov 0  }
   0x3 LB: > { %s555_s26 = sadd.s32 4294967295, %s701_s25   ;;  %s32_s27 = sadd.s32 1, %s693_s23  ;;  %s701_s25 = sphi %s749_s25, %s17_s25   ;;  %s697_s24 = sphi %s747_s24, %s837_s24   ;;  %s693_s23 = sphi %s745_s23, %s836_s23   ;;  %s689_s22 = sphi %s743_s22, %s835_s22   ;;  %s685_s21 = sphi %s741_s21, %s834_s21  }
   0x4   : > { %p34_p0 = scmp.ge.s32.totalorder %s32_s27, 2  ;;  %s36_s28 = sadd.s32 1, %s697_s24 }
   0x5   : > { %p558_p1 = scmp.ge.s32.totalorder %s701_s25, 1  ;;  %p234_p2 = scmp.lt.s32.totalorder %s701_s25, 5 }
   0x6   : > { %s839_s27 = smov (%p34_p0, %s32_s27), 0  ;;  %s841_s28 = smov (!%p34_p0, %s36_s28), %s697_s24 }
   0x7   : > { %p235_p3 = pnand %p558_p1, %p234_p2  ;;  %p38_p4 = scmp.ge.s32.totalorder %s841_s28, 2 }
   0x8   : > { %p264_p5 = scmp.lt.s32.totalorder (!%p235_p3), %s685_s21, 1  ;;  %p277_p6 = scmp.eq.s32.totalorder (!%p235_p3), %s685_s21, 1 }
   0x9   : > { %s843_s28 = smov (%p38_p4, %s841_s28), 0  ;;  %238 = sbr.rel (%p235_p3) target bundleno = 889 (0x379), region = 44 }
   0xa   : > { %p273_p7 = scmp.eq.s32.totalorder (!%p235_p3), %s685_s21, 0  ;;  %p335_p8 = scmp.eq.s32.totalorder (!%p235_p3), %s689_s22, 0 }
   0xc   : > { %p336_p9 = pnand (!%p235_p3), %p335_p8, %p273_p7 }
   0xe   : > { %s265_s29 = scalar_select %p264_p5, %s685_s21, 1  ;;  %vm290_vm0 = vcmask 1043456   ;;  %v281_v1 = vld [vmem:[%s828_s1] sm:$0xff]  ;;  %vm286_vm1 = vcmask 31744  }
  0x10   : > { %s574_s30 = sshll.u32 %s265_s29, 3 }
  0x11   : > { %s271_s9 = scalar_lea.vmem %s827_s0, %s574_s30 }
  0x12   : > { %v280_v0 = vld [vmem:[%s271_s9] sm:$0xff] }
  0x13   : > { %283 = vst [vmem:[#allocation1] ss:$2 sm:$0xff] %v280_v0 }
  0x1a   : > { %v284_v2 = vld.sshfl [vmem:[#allocation1] sm:$0xff pattern:$0x75316420]  ;;  %v285_v3 = vld.sshfl [vmem:[#allocation1 + $0x8] sm:$0xff pattern:$0x75316420] }
  0x1b   : > { %563 = vmatpush.msk.msra.mxu0 %vm290_vm0, %v284_v2  ;;  %565 = vmatpush.msk.msra.mxu1 %vm290_vm0, %v285_v3 }
  0x1c   : > { %564 = vmatmul.msk.f32.vlgmr.msra.gmra.mxu0 %vm286_vm1, %v281_v1  ;;  %566 = vmatmul.msk.f32.vlgmr.msra.gmra.mxu1 %vm286_vm1, %v281_v1 }
  0x95   : > { %339 = sbr.rel (%p336_p9) target bundleno = 158 (0x9e), region = 48 }
  0x99   : > { %v312_v4 = vpop.f32.mrf.mxu0  ;;  %v332_v5 = vpop.f32.mrf.mxu1 }
  0x9a   : > { %vm340_vm2 = vcmask 7168   ;;  %vm343_vm3 = vcmask 15360   ;;  %v703_v6 = vmov 0.0  }
  0x9b   : > { %341 = vst.msk [vmem:[#allocation2] sm:$0xff] %vm340_vm2, %v703_v6 }
  0x9c   : > { %342 = vst.msk [vmem:[#allocation3] sm:$0xff] %vm340_vm2, %v703_v6 }
  0x9d   : > { %344 = vst.msk [vmem:[#allocation4] sm:$0xff] %vm343_vm3, %v703_v6 }
  0x9e PF: > { %p567_p10 = scmp.ne.s32.totalorder %s689_s22, 0 }
  0xa0   : > { %347 = sbr.rel (%p567_p10) target bundleno = 294 (0x126), region = 52 }
  0xa5   : > { %v349_v7 = vadd.f32 %v332_v5, %v312_v4  ;;  %v356_v8 = vmul.f32 %v312_v4, %v312_v4  ;;  %v357_v9 = vmul.f32 %v332_v5, %v332_v5  ;;  %v348_v11 = vld [vmem:[#allocation2] sm:$0xff]  ;;  %vm353_vm4 = vcmask 7168   ;;  %v355_v14 = vld [vmem:[#allocation3] sm:$0xff] }
  0xa7   : > { %350 = vadd.xlane.f32.xlu0 %v349_v7  ;;  %v358_v10 = vadd.f32 %v357_v9, %v356_v8 }
  0xaf   : > { %359 = vadd.xlane.f32.xlu0 %v358_v10 }
 0x11a   : > { %v351_v12 = vpop.xlane.xlu0 %350 }
 0x11b   : > { %v352_v13 = vadd.f32 %v351_v12, %v348_v11 }
 0x11d   : > { %354 = vst.msk [vmem:[#allocation2] sm:$0xff] %vm353_vm4, %v352_v13 }
 0x122   : > { %v360_v15 = vpop.xlane.xlu0 %359 }
 0x123   : > { %v361_v16 = vadd.f32 %v360_v15, %v355_v14 }
 0x125   : > { %362 = vst.msk [vmem:[#allocation3] sm:$0xff] %vm353_vm4, %v361_v16 }
 0x126 PF: > { %p363_p11 = scmp.eq.s32.totalorder %s689_s22, 1  ;;  %p568_p12 = scmp.ne.s32.totalorder %s689_s22, 1 }
 0x128   : > { %366 = sbr.rel (%p568_p12) target bundleno = 579 (0x243), region = 56 }
 0x12d   : > { %v367_v17 = vld [vmem:[#allocation2] sm:$0xff]  ;;  %v369_v18 = vld [vmem:[#allocation3] sm:$0xff]  ;;  %v704_v19 = vmov 0   ;;  %v373_v30 = vld [vmem:[%s829_s2] sm:$0xff]  ;;  %v408_v46 = vlaneseq  ;;  %v411_v48 = vstv %s685_s21  ;;  %vm415_vm9 = vcmask 15360  }
 0x12e   : > { %627 = vset.pattern.permute.xlu0 %v704_v19  ;;  %v368_v20 = vmul.f32 0.001953125, %v367_v17  ;;  %v370_v21 = vmul.f32 0.001953125, %v369_v18  ;;  %v374_v35 = vld [vmem:[%s830_s3] sm:$0xff]  ;;  %v410_v49 = vld [vmem:[#allocation4] sm:$0xff] }
 0x12f   : > { %v409_v47 = vand.u32 127, %v408_v46 }
 0x130   : > { %v371_v22 = vmul.f32 %v368_v20, %v368_v20 }
 0x131   : > { %vm412_vm8 = vcmp.eq.s32.totalorder %v409_v47, %v411_v48 }
 0x132   : > { %v372_v23 = vsub.f32 %v370_v21, %v371_v22 }
 0x134   : > { %v375_v24 = vadd.f32 1e-05, %v372_v23 }
 0x136   : > { %628 = vrsqrt.f32 %v375_v24  ;;  %vm382_vm5 = vweird.f32 %v375_v24 }
 0x13c   : > { %v629_v25 = vpop.eup %628 }
 0x13d   : > { %v377_v26 = vmul.f32 %v629_v25, %v375_v24  ;;  %vm383_vm6 = vweird.f32 %v629_v25 }
 0x13e   : > { %vm384_vm7 = vmor %vm382_vm5, %vm383_vm6 }
 0x13f   : > { %v378_v27 = vmul.f32 %v629_v25, %v377_v26 }
 0x141   : > { %v379_v28 = vmul.f32 0.5, %v378_v27 }
 0x143   : > { %v380_v29 = vsub.f32 1.5, %v379_v28 }
 0x145   : > { %v381_v31 = vmul.f32 %v629_v25, %v380_v29 }
 0x147   : > { %v385_v32 = vsel %vm384_vm7, %v629_v25, %v381_v31 }
 0x148   : > { %v386_v33 = vmul.f32 %v385_v32, %v373_v30 }
 0x14a   : > { %391 = vperm.xlu0 %627, %v386_v33   ;;  %v387_v34 = vmul.f32 %v386_v33, %v368_v20 }
 0x14c   : > { %v388_v36 = vsub.f32 %v374_v35, %v387_v34 }
 0x152   : > { %398 = vperm.xlu0 %627, %v388_v36  }
 0x1bc   : > { %v392_v37 = vpop.permute.xlu0 %391 }
 0x1bd   : > { %v394_v38 = vmul.f32 %v392_v37, %v312_v4  ;;  %v395_v39 = vmul.f32 %v392_v37, %v332_v5 }
 0x1c4   : > { %v399_v40 = vpop.permute.xlu0 %398 }
 0x1c5   : > { %v401_v41 = vadd.f32 %v399_v40, %v394_v38  ;;  %v402_v42 = vadd.f32 %v399_v40, %v395_v39 }
 0x1c7   : > { %v403_v43 = vmax.f32 %v401_v41, 0.0  ;;  %v404_v44 = vmax.f32 %v402_v42, 0.0 }
 0x1c9   : > { %v405_v45 = vadd.f32 %v404_v44, %v403_v43 }
 0x1cb   : > { %406 = vadd.xlane.f32.xlu1 %v405_v45 }
 0x23e   : > { %v407_v50 = vpop.xlane.xlu1 %406 }
 0x23f   : > { %v413_v51 = vsel %vm412_vm8, %v407_v50, 0.0 }
 0x240   : > { %v414_v52 = vadd.f32 %v413_v51, %v410_v49 }
 0x242   : > { %416 = vst.msk [vmem:[#allocation4] sm:$0xff] %vm415_vm9, %v414_v52 }
 0x243 PF: > { %p417_p13 = pnand %p363_p11, %p277_p6 }
 0x245   : > { %420 = sbr.rel (%p417_p13) target bundleno = 883 (0x373), region = 60 }
 0x24a   : > { %v421_v53 = vld [vmem:[#allocation4] sm:$0xff]  ;;  %v455_v54 = vld [vmem:[%s831_s4] sm:$0xff]  ;;  %vm460_vm10 = vcmask 64512   ;;  %vm484_vm11 = vcmask 41984  }
 0x24b   : > { %422 = vxpose.xlu0.b32.start.end [1/1] (short) (narrow) %v421_v53, 8  ;;  %479 = vmatpush.msra.mxu0 %v455_v54  ;;  %v630_v57 = vld [vmem:[%s832_s5] ss:$0 sm:$0xff] }
 0x2ef   : > { %v438_v55 = vpop.trf.xlu0 }
 0x2f0   : > { %v454_v56 = vmul.f32 0.00390625, %v438_v55 }
 0x2f2   : > { %569 = vmatmul.msk.f32.vlgmr.msra.gmra.mxu0 %vm460_vm10, %v454_v56 }
 0x36f   : > { %v481_v58 = vpop.f32.mrf.mxu0 }
 0x370   : > { %v482_v59 = vadd.f32 %v630_v57, %v481_v58 }
 0x372   : > { %485 = vst.msk [vmem:[#allocation5] sm:$0x3] %vm484_vm11, %v482_v59 }
 0x373 PF: > { %p581_p0 = scmp.eq.s32.totalorder %s555_s26, 3  ;;  %s494_s22 = sshll.u32 %s833_s6, 4  ;;  %s495_s22 = int_to_ptr.hbm [resolvable:$true] %s494_s22 }
 0x374   : > { %s705_s29 = smov [#allocation5]  }
 0x375   : > { %s492_s30 = sshll.u32 %s705_s29, 4  ;;  %s493_s30 = int_to_ptr.vmem [resolvable:$true] %s492_s30 }
 0x376   : > { %578 = dma.vmem_to_hbm [thread:$0]  (%p581_p0), %s493_s30, 32, %s495_s22, [#allocation6]  }
 0x377   : > { %680 = dma.done.wait (%p581_p0), [#allocation6], 32  }
 0x378   : > { %682 = vsyncadd (%p581_p0), [#allocation6], 4294967264 }
 0x379 PF: > { %s17_s25 = sadd.s32 1, %s701_s25   ;;  %s834_s21 = smov %s693_s23 }
 0x37a   : > { %p14_p1 = scmp.ge.s32.totalorder %s17_s25, 6   ;;  %s835_s22 = smov %s697_s24 }
 0x37b   : > { %s836_s23 = smov %s839_s27  ;;  %s837_s24 = smov %s843_s28 }
 0x37c   :  { %16 = sbr.rel (!%p14_p1) target bundleno = 3 (0x3), region = 87 }
 0x381   :  { %508 = vsyncpa [#allocation6], 1 }
 0x382   :  { %510 = vsyncpa [#allocation6 + $0x1], 1 }

</bundles_post_ra>
